<compile_context>
chip_gen: v7x
topology: tpu7x:2x2x1
jax: 0.10.0
libtpu: 0.0.40
codegen_flags: <defaults>
</compile_context>

<pallas_src>
import functools

import jax
import jax.numpy as jnp
from jax.experimental import pallas as pl
from jax.experimental.pallas import tpu as pltpu

GRAN = 16   # batch-tile granularity: bf16 sublane packing (also a multiple of 8)


def _round_up(n, m):
    return (n + m - 1) // m * m


def _choose_bt(B, block_b):
    """Pick the batch tile size.

    * B <= GRAN: one full-extent block (block dim == array dim is always legal).
    * Otherwise: aim for >= 2 grid steps (two v7x TensorCores + something for
      the double-buffered x/out DMAs to overlap), rounded to GRAN rows, capped
      at block_b so per-step overhead stays amortized for huge batches.
    """
    if B <= GRAN:
        return B
    return min(block_b, _round_up(pl.cdiv(B, 2), GRAN))


def mlp_kernel(x_ref, w1_ref, b1_ref, w2_ref, b2_ref, o_ref):
    """Fused 2-layer MLP on one batch tile.

    Both matmuls accumulate in f32 on the MXU; the hidden activation stays in
    vregs/VMEM.  Bias add + sigmoid are kept in f32 (safe on v5e, EUP slot is
    effectively free next to the MXU/DMA work).  x is cast to the weight dtype
    here (VPU cast) so the wrapper never materializes a converted copy of x.
    """
    x = x_ref[...].astype(w1_ref.dtype)
    # Layer 1: Linear + sigmoid
    h = jnp.dot(x, w1_ref[...], preferred_element_type=jnp.float32)
    h = jax.nn.sigmoid(h + b1_ref[...])                       # f32 elementwise
    # Layer 2: Linear + sigmoid (only the matmul LHS is cast to the weight
    # dtype; accumulation, bias and sigmoid remain f32).
    y = jnp.dot(h.astype(w2_ref.dtype), w2_ref[...],
                preferred_element_type=jnp.float32)
    o_ref[...] = jax.nn.sigmoid(y + b2_ref[...]).astype(o_ref.dtype)


def prepare_params(w1, b1, w2, b2, matmul_dtype=jnp.bfloat16):
    """One-time parameter prep, hoisted out of the per-call forward path.

    Casts weights to the MXU input dtype (bf16 by default -> halves weight DMA
    traffic and runs the MXU at native bf16 rate on v6e/v7x) and keeps biases
    in f32 as 2-D [1, H] rows.
    """
    return (jnp.asarray(w1, matmul_dtype),
            jnp.asarray(b1, jnp.float32).reshape(1, -1),
            jnp.asarray(w2, matmul_dtype),
            jnp.asarray(b2, jnp.float32).reshape(1, -1))


@functools.partial(jax.jit, static_argnames=("block_b",))
def mlp_forward(x, w1, b1, w2, b2, *, block_b=1024):
    """x: [B, in]; w1: [in, h1]; b1: [1, h1]; w2: [h1, out]; b2: [1, out].

    Only the batch dimension is tiled; all feature dims use full-extent blocks
    (no padding, no post-call slicing).  Weights/biases are pinned in VMEM
    (constant index_map -> fetched once); x / out tiles are software-pipelined.
    """
    B, f_in = x.shape
    h1 = w1.shape[1]
    f_out = w2.shape[1]

    bt = _choose_bt(B, block_b)
    grid = (pl.cdiv(B, bt),)

    itemsize = lambda a: a.dtype.itemsize
    cost = pl.CostEstimate(
        flops=2 * B * (f_in * h1 + h1 * f_out),
        transcendentals=B * (h1 + f_out),
        bytes_accessed=(B * f_in * itemsize(x)
                        + f_in * h1 * itemsize(w1) + h1 * itemsize(b1)
                        + h1 * f_out * itemsize(w2) + f_out * itemsize(b2)
                        + B * f_out * itemsize(x)),
    )

    return pl.pallas_call(
        mlp_kernel,
        out_shape=jax.ShapeDtypeStruct((B, f_out), x.dtype),
        grid=grid,
        in_specs=[
            pl.BlockSpec((bt, f_in), lambda i: (i, 0)),     # streamed batch tile
            pl.BlockSpec((f_in, h1), lambda i: (0, 0)),     # pinned in VMEM
            pl.BlockSpec((1, h1), lambda i: (0, 0)),        # pinned
            pl.BlockSpec((h1, f_out), lambda i: (0, 0)),    # pinned
            pl.BlockSpec((1, f_out), lambda i: (0, 0)),     # pinned
        ],
        out_specs=pl.BlockSpec((bt, f_out), lambda i: (i, 0)),
        compiler_params=pltpu.CompilerParams(
            # Batch tiles are independent -> shard across TensorCores on v7x.
            dimension_semantics=("parallel",),
        ),
        cost_estimate=cost,
    )(x, w1, b1, w2, b2)


def reference_forward(x, w1, b1, w2, b2):
    h = jax.nn.sigmoid(x @ w1 + b1)
    return jax.nn.sigmoid(h @ w2 + b2)


if __name__ == "__main__":
    # Shapes consistent with the module: Model(input_size=32, h1=64, output_size=16)
    batch, input_size, h1, output_size = 8, 32, 64, 16

    key = jax.random.PRNGKey(0)
    kx, kw1, kb1, kw2, kb2 = jax.random.split(key, 5)

    x = jax.random.normal(kx, (batch, input_size), dtype=jnp.float32)

    # PyTorch-style uniform(-1/sqrt(fan_in), 1/sqrt(fan_in)) init, stored
    # pre-transposed to [in, out] for the kernel.
    bound1 = 1.0 / jnp.sqrt(jnp.float32(input_size))
    w1 = jax.random.uniform(kw1, (input_size, h1), jnp.float32, -bound1, bound1)
    b1 = jax.random.uniform(kb1, (1, h1), jnp.float32, -bound1, bound1)
    bound2 = 1.0 / jnp.sqrt(jnp.float32(h1))
    w2 = jax.random.uniform(kw2, (h1, output_size), jnp.float32, -bound2, bound2)
    b2 = jax.random.uniform(kb2, (1, output_size), jnp.float32, -bound2, bound2)

    ref = reference_forward(x, w1, b1, w2, b2)

    # Default path: bf16 MXU inputs (weights pre-cast once, x cast in-kernel).
    p_bf16 = prepare_params(w1, b1, w2, b2)                    # one-time prep
    out = jax.block_until_ready(mlp_forward(x, *p_bf16))
    assert out.shape == (batch, output_size), out.shape
    assert jnp.allclose(out, ref, atol=5e-2), "bf16 mismatch vs reference"

    # f32 path (bit-for-bit-ish vs. the reference).
    p_f32 = prepare_params(w1, b1, w2, b2, matmul_dtype=jnp.float32)
    out_f32 = jax.block_until_ready(mlp_forward(x, *p_f32))
    assert jnp.allclose(out_f32, ref, atol=1e-5, rtol=1e-5), "f32 mismatch vs reference"

    # Multi-step grid + ragged last batch tile (B=200, bt=112 -> grid=2,
    # second tile has 88 valid rows; OOB rows read garbage but stores are masked).
    xb = jax.random.normal(jax.random.PRNGKey(1), (200, input_size), jnp.float32)
    out_b = jax.block_until_ready(mlp_forward(xb, *p_bf16))
    ref_b = reference_forward(xb, w1, b1, w2, b2)
    assert out_b.shape == (200, output_size), out_b.shape
    assert jnp.allclose(out_b, ref_b, atol=5e-2), "batched bf16 mismatch"
    out_bf = jax.block_until_ready(mlp_forward(xb, *p_f32))
    assert jnp.allclose(out_bf, ref_b, atol=1e-5, rtol=1e-5), "batched f32 mismatch"

    # TODO(synk): Model.predict's >=0.5 thresholding is a host-side scalar
    # decision, not kernelized.

    print("KERNEL_OK")
</pallas_src>

<mosaic_0001>
module attributes {stable_mosaic.version = 11 : i64} {
  func.func @mlp_kernel(%arg0: i32, %arg1: memref<8x32xf32, #tpu.memory_space<vmem>>, %arg2: memref<32x64xbf16, #tpu.memory_space<vmem>>, %arg3: memref<1x64xf32, #tpu.memory_space<vmem>>, %arg4: memref<64x16xbf16, #tpu.memory_space<vmem>>, %arg5: memref<1x16xf32, #tpu.memory_space<vmem>>, %arg6: memref<8x16xf32, #tpu.memory_space<vmem>>) attributes {dimension_semantics = [#tpu.dimension_semantics<parallel>], iteration_bounds = array<i64: 1>, scalar_prefetch = 0 : i64, scratch_operands = 0 : i64, tpu.core_type = #tpu.core_type<tc>, window_params = [{transform_indices = @transform_0, window_bounds = array<i64: 8, 32>}, {pipeline_mode = #tpu.pipeline_mode<synchronous>, transform_indices = @transform_1, window_bounds = array<i64: 32, 64>}, {pipeline_mode = #tpu.pipeline_mode<synchronous>, transform_indices = @transform_2, window_bounds = array<i64: 1, 64>}, {pipeline_mode = #tpu.pipeline_mode<synchronous>, transform_indices = @transform_3, window_bounds = array<i64: 64, 16>}, {pipeline_mode = #tpu.pipeline_mode<synchronous>, transform_indices = @transform_4, window_bounds = array<i64: 1, 16>}, {transform_indices = @transform_5, window_bounds = array<i64: 8, 16>}]} {
    %c0 = arith.constant 0 : index
    %c0_0 = arith.constant 0 : index
    %0 = vector.load %arg1[%c0, %c0_0] : memref<8x32xf32, #tpu.memory_space<vmem>>, vector<8x32xf32>
    %1 = arith.truncf %0 : vector<8x32xf32> to vector<8x32xbf16>
    %c0_1 = arith.constant 0 : index
    %c0_2 = arith.constant 0 : index
    %2 = vector.load %arg2[%c0_1, %c0_2] : memref<32x64xbf16, #tpu.memory_space<vmem>>, vector<32x64xbf16>
    %cst = arith.constant dense<0.000000e+00> : vector<8x64xf32>
    %3 = tpu.matmul %1, %2, %cst {dimension_numbers = #tpu.dot_dimension_numbers<[1], [0], [0], [1], [0, 0, 1, 1], [], []>} : vector<8x32xbf16>, vector<32x64xbf16>, vector<8x64xf32> -> vector<8x64xf32>
    %c0_3 = arith.constant 0 : index
    %c0_4 = arith.constant 0 : index
    %4 = vector.load %arg3[%c0_3, %c0_4] : memref<1x64xf32, #tpu.memory_space<vmem>>, vector<1x64xf32>
    %5 = vector.broadcast %4 : vector<1x64xf32> to vector<8x64xf32>
    %6 = arith.addf %3, %5 : vector<8x64xf32>
    %7 = arith.negf %6 : vector<8x64xf32>
    %8 = math.exp %7 : vector<8x64xf32>
    %cst_5 = arith.constant 1.000000e+00 : f32
    %9 = vector.broadcast %cst_5 : f32 to vector<8x64xf32>
    %10 = arith.addf %9, %8 : vector<8x64xf32>
    %11 = arith.divf %9, %10 : vector<8x64xf32>
    %12 = arith.truncf %11 : vector<8x64xf32> to vector<8x64xbf16>
    %c0_6 = arith.constant 0 : index
    %c0_7 = arith.constant 0 : index
    %13 = vector.load %arg4[%c0_6, %c0_7] : memref<64x16xbf16, #tpu.memory_space<vmem>>, vector<64x16xbf16>
    %cst_8 = arith.constant dense<0.000000e+00> : vector<8x16xf32>
    %14 = tpu.matmul %12, %13, %cst_8 {dimension_numbers = #tpu.dot_dimension_numbers<[1], [0], [0], [1], [0, 0, 1, 1], [], []>} : vector<8x64xbf16>, vector<64x16xbf16>, vector<8x16xf32> -> vector<8x16xf32>
    %c0_9 = arith.constant 0 : index
    %c0_10 = arith.constant 0 : index
    %15 = vector.load %arg5[%c0_9, %c0_10] : memref<1x16xf32, #tpu.memory_space<vmem>>, vector<1x16xf32>
    %16 = vector.broadcast %15 : vector<1x16xf32> to vector<8x16xf32>
    %17 = arith.addf %14, %16 : vector<8x16xf32>
    %18 = arith.negf %17 : vector<8x16xf32>
    %19 = math.exp %18 : vector<8x16xf32>
    %cst_11 = arith.constant 1.000000e+00 : f32
    %20 = vector.broadcast %cst_11 : f32 to vector<8x16xf32>
    %21 = arith.addf %20, %19 : vector<8x16xf32>
    %22 = arith.divf %20, %21 : vector<8x16xf32>
    %c0_12 = arith.constant 0 : index
    %c0_13 = arith.constant 0 : index
    %23 = vector.load %arg6[%c0_12, %c0_13] : memref<8x16xf32, #tpu.memory_space<vmem>>, vector<8x16xf32>
    tpu.vector_store %arg6[%c0_12, %c0_13], %22 {strides = array<i32>} : memref<8x16xf32, #tpu.memory_space<vmem>>, vector<8x16xf32>,
    return
  }
  func.func @transform_0(%arg0: i32) -> (i32, i32) {
    %c0_i32 = arith.constant 0 : i32
    %c0_i32_0 = arith.constant 0 : i32
    return %arg0, %c0_i32 : i32, i32
  }
  func.func @transform_1(%arg0: i32) -> (i32, i32) {
    %c0_i32 = arith.constant 0 : i32
    %c0_i32_0 = arith.constant 0 : i32
    %c0_i32_1 = arith.constant 0 : i32
    return %c0_i32, %c0_i32_0 : i32, i32
  }
  func.func @transform_2(%arg0: i32) -> (i32, i32) {
    %c0_i32 = arith.constant 0 : i32
    %c0_i32_0 = arith.constant 0 : i32
    %c0_i32_1 = arith.constant 0 : i32
    return %c0_i32, %c0_i32_0 : i32, i32
  }
  func.func @transform_3(%arg0: i32) -> (i32, i32) {
    %c0_i32 = arith.constant 0 : i32
    %c0_i32_0 = arith.constant 0 : i32
    %c0_i32_1 = arith.constant 0 : i32
    return %c0_i32, %c0_i32_0 : i32, i32
  }
  func.func @transform_4(%arg0: i32) -> (i32, i32) {
    %c0_i32 = arith.constant 0 : i32
    %c0_i32_0 = arith.constant 0 : i32
    %c0_i32_1 = arith.constant 0 : i32
    return %c0_i32, %c0_i32_0 : i32, i32
  }
  func.func @transform_5(%arg0: i32) -> (i32, i32) {
    %c0_i32 = arith.constant 0 : i32
    %c0_i32_0 = arith.constant 0 : i32
    return %arg0, %c0_i32 : i32, i32
  }
}

</mosaic_0001>

<bundles_post_ra>
// kernel: mlp_forward.1
= control target key start
LH: loop header
LB: loop body
LE: loop exit
PB: predicated region body
PF: predicated region fallthrough
CT: control target
= control target key end

     0   :  { %v284_v1 = vmov 0.0   ;;  %vm285_vm0 = vmmov 0   ;;  %s356_s0 = inlined_call_operand.vmem [shape: f32[8,32], index: 0, kind: input, shape index: {}]   ;;  %s357_s1 = inlined_call_operand.vmem [shape: bf16[32,64], index: 1, kind: input, shape index: {}]   ;;  %s358_s2 = inlined_call_operand.vmem [shape: f32[1,64], index: 2, kind: input, shape index: {}]   ;;  %s359_s3 = inlined_call_operand.vmem [shape: bf16[64,16], index: 3, kind: input, shape index: {}]   ;;  %s360_s4 = inlined_call_operand.vmem [shape: f32[1,16], index: 4, kind: input, shape index: {}]   ;;  %s361_s5 = inlined_call_operand.hbm [shape: f32[8,16], index: 5, kind: output, shape index: {}]  }
   0x1   :  { %v246_v0 = vld [vmem:[%s357_s1] sm:$0xff]   ;;  %223 = vmatprep.subr.bf16.mxu0 %v284_v1  ;;  %231 = vmatprep.subr.bf16.mxu1 %v284_v1  ;;  %v247_v2 = vld [vmem:[%s357_s1 + $0x8] sm:$0xff]  }
   0x2   :  { %224 = vmatpush3.bf16.msra.mxu0 %v246_v0  ;;  %227 = vmatprep.mubr.msk.bf16.mxu0 %vm285_vm0, %v284_v1  ;;  %v22_v3 = vld [vmem:[%s356_s0] sm:$0xff] }
   0x3   :  { %225 = vmatprep.subr.bf16.mxu0 %v284_v1  ;;  %239 = vmatprep.mubr.msk.bf16.mxu1 %vm285_vm0, %v284_v1  ;;  %v23_v4 = vpack.c.bf16 %v22_v3, %v22_v3 }
   0x4   :  { %10 = vsyncpa [#allocation3], 0  ;;  %vm47_vm1 = vcmask 261120   ;;  %v248_v5 = vld [vmem:[%s359_s3] sm:$0xff]   ;;  %v249_v6 = vld [vmem:[%s359_s3 + $0x8] sm:$0xff]   ;;  %vm137_vm2 = vcmask 523264  }
   0x5   :  { %232 = vmatpush3.bf16.msra.mxu1 %v248_v5  ;;  %v250_v7 = vld [vmem:[%s359_s3 + $0x10] sm:$0xff]   ;;  %v251_v8 = vld [vmem:[%s359_s3 + $0x18] sm:$0xff]   ;;  %v203_v9 = vld [vmem:[%s358_s2] ss:$0 sm:$0xff]  ;;  %s286_s2 = smov [#allocation2]   ;;  %vm187_vm3 = vcmask 130048  }
   0x6   :  { %226 = vmatpush3.bf16.msra.mxu0 %v247_v2  ;;  %233 = vmatprep.subr.bf16.mxu1 %v284_v1  ;;  %v208_v20 = vld [vmem:[%s360_s4] ss:$0 sm:$0xff]  ;;  %s195_s8 = sshll.u32 %s286_s2, 4  ;;  %s196_s8 = int_to_ptr.vmem [resolvable:$true] %s195_s8 }
   0x7   :  { %s260_s9 = scalar_lea.vmem %s196_s8, 128  ;;  %p265_p1 = scmp.lt.s32.totalorder %s196_s8, %s196_s8 }
   0x8   :  { %p261_p0 = scmp.ne.s32.totalorder %s196_s8, %s260_s9  ;;  %p266_p2 = scmp.lt.s32.totalorder %s260_s9, %s260_s9 }
   0x9   :  { %228 = vmatmul.mubr.msk.bf16.vlgmr.msra.gmra.mrb[0].mxu0 %vm47_vm1, %v23_v4  ;;  %234 = vmatpush3.bf16.msra.mxu1 %v249_v6 }
   0xa   :  { %235 = vmatprep.subr.bf16.mxu1 %v284_v1  ;;  %p267_p3 = por %p266_p2, %p265_p1 }
   0xc   :  { %p268_p4 = pnand %p267_p3, %p261_p0 }
   0xd   :  { %236 = vmatpush3.bf16.msra.mxu1 %v250_v7 }
   0xe   :  { %237 = vmatprep.subr.bf16.mxu1 %v284_v1 }
  0x11   :  { %238 = vmatpush3.bf16.msra.mxu1 %v251_v8 }
  0xdc   :  { %v85_v10 = vpop.f32.mrb[0].mxu0 }
  0xdd   :  { %v86_v11 = vadd.f32 %v203_v9, %v85_v10  ;;  %v229_v12 = vpop.f32.mrb[1].mxu0 }
  0xde   :  { %v88_v13 = vpop.f32.mrb[2].mxu0 }
  0xdf   :  { %v207_v14 = vmul.f32 -1.442695, %v86_v11  ;;  %v230_v15 = vpop.f32.mrb[3].mxu0 }
  0xe1   :  { %252 = vpow2.f32 %v207_v14 }
  0xeb   :  { %v253_v16 = vpop.eup %252 }
  0xec   :  { %v94_v17 = vadd.f32 1.0, %v253_v16 }
  0xee   :  { %254 = vrcp.f32 %v94_v17 }
  0xf8   :  { %v255_v18 = vpop.eup %254 }
  0xf9   :  { %v97_v19 = vpack.c.bf16 %v255_v18, %v255_v18 }
  0xfb   :  { %240 = vmatmul.mubr.msk.bf16.vlgmr.msra.gmra.mrb[0].mxu1 %vm137_vm2, %v97_v19 }
 0x1ce   :  { %v175_v21 = vpop.f32.mrb[0].mxu1 }
 0x1cf   :  { %v176_v22 = vadd.f32 %v208_v20, %v175_v21  ;;  %v241_v23 = vpop.f32.mrb[1].mxu1 }
 0x1d0   :  { %v178_v24 = vpop.f32.mrb[2].mxu1 }
 0x1d1   :  { %v214_v25 = vmul.f32 -1.442695, %v176_v22  ;;  %v242_v26 = vpop.f32.mrb[3].mxu1 }
 0x1d3   :  { %256 = vpow2.f32 %v214_v25 }
 0x1dd   :  { %v257_v27 = vpop.eup %256 }
 0x1de   :  { %v184_v28 = vadd.f32 1.0, %v257_v27 }
 0x1e0   :  { %258 = vrcp.f32 %v184_v28 }
 0x1ea   :  { %v259_v29 = vpop.eup %258 }
 0x1eb   :  { %188 = vst.msk [vmem:[#allocation2] sm:$0xff] %vm187_vm3, %v259_v29 }
 0x1ec   :  { %271 = shalt.err (!%p268_p4)
}
 0x1ed   :  { %s272_s11 = scalar_lea.hbm %s361_s5, 128 }
 0x1ee   :  { %p273_p5 = scmp.ne.s32.totalorder %s361_s5, %s272_s11  ;;  %p276_p6 = scmp.lt.u32.totalorder %s272_s11, %s361_s5 }
 0x1f0   :  { %p278_p7 = pnand %p276_p6, %p273_p5 }
 0x1f2   :  { %281 = shalt.err (!%p278_p7)
}
 0x1f3   :  { %198 = dma.vmem_to_hbm [thread:$0]  %s196_s8, 128, %s361_s5, [#allocation3]  }
 0x1f4   :  { %282 = dma.done.wait [#allocation3], 128  }
 0x1f5   :  { %283 = vsyncadd [#allocation3], 4294967168 }
 0x1f6   :  { %202 = vsyncpa [#allocation3], 1 }

</bundles_post_ra>
